<compile_context>
chip_gen: v7x
topology: tpu7x:2x2x1
jax: 0.10.0
libtpu: 0.0.40
codegen_flags: <defaults>
</compile_context>

<pallas_src>
import functools
import math

import jax
import jax.numpy as jnp
from jax import lax
from jax.experimental import pallas as pl
from jax.experimental.pallas import tpu as pltpu


# bf16 MXU operands (f32 accumulation) for the attention matmuls.
MXU_BF16 = True


def _vmem_limit_bytes():
    """3/4 of physical VMEM: ~48 MiB on v7x (64 MiB), ~96 MiB on v5e/v6e (128
    MiB).  Leaves headroom for compiler-internal scratch and double buffers."""
    cap = 64 * 1024 * 1024
    try:
        cap = int(getattr(pltpu.get_tpu_info(), "vmem_capacity_bytes", cap))
    except Exception:
        pass
    return (cap // 4) * 3


_VMEM_LIMIT = _vmem_limit_bytes()


def _row_tile(m):
    # Projections are HBM-bound: bigger row tiles on the 128 MiB chips.
    cap = 1024 if _VMEM_LIMIT >= 80 * 1024 * 1024 else 512
    return m if m <= cap else cap


# ---------------------------------------------------------------------------
# Linear projection kernels (weights pre-transposed to (d_in, d_out))
# ---------------------------------------------------------------------------

def _linear_kernel(x_ref, w_ref, b_ref, o_ref):
    o_ref[...] = (jnp.dot(x_ref[...], w_ref[...],
                          preferred_element_type=jnp.float32)
                  + b_ref[...]).astype(o_ref.dtype)


def linear(x2d, w_t, b):
    """y = x2d @ w_t + b; rows grid-tiled, weight/bias resident across the grid.
    Tail row tiles compute on padded data that is discarded on writeback."""
    M, d_in = x2d.shape
    d_out = w_t.shape[1]
    tm = _row_tile(M)
    return pl.pallas_call(
        _linear_kernel,
        out_shape=jax.ShapeDtypeStruct((M, d_out), x2d.dtype),
        grid=(pl.cdiv(M, tm),),
        in_specs=[
            pl.BlockSpec((tm, d_in), lambda i: (i, 0)),
            pl.BlockSpec((d_in, d_out), lambda i: (0, 0)),   # resident weight
            pl.BlockSpec((1, d_out), lambda i: (0, 0)),      # resident bias
        ],
        out_specs=pl.BlockSpec((tm, d_out), lambda i: (i, 0)),
        compiler_params=pltpu.CompilerParams(
            dimension_semantics=("parallel",),
            vmem_limit_bytes=_VMEM_LIMIT),
    )(x2d, w_t, b.reshape(1, d_out))


def _qkv_fused_kernel(x_ref, w_ref, b_ref, q_ref, k_ref, v_ref):
    d = q_ref.shape[-1]
    y = jnp.dot(x_ref[...], w_ref[...],
                preferred_element_type=jnp.float32) + b_ref[...]
    # Static lane slices at multiples of d_model (128-multiples at real sizes).
    q_ref[...] = y[:, :d].astype(q_ref.dtype)
    k_ref[...] = y[:, d:2 * d].astype(k_ref.dtype)
    v_ref[...] = y[:, 2 * d:].astype(v_ref.dtype)


def qkv_projection_fused(x2d, w_qkv_t, b_qkv):
    """One (tm, d) x (d, 3d) MXU dot per row tile instead of three narrow dots."""
    M, d_model = x2d.shape
    tm = _row_tile(M)
    out_sd = jax.ShapeDtypeStruct((M, d_model), x2d.dtype)
    out_spec = pl.BlockSpec((tm, d_model), lambda i: (i, 0))
    return pl.pallas_call(
        _qkv_fused_kernel,
        out_shape=(out_sd, out_sd, out_sd),
        grid=(pl.cdiv(M, tm),),
        in_specs=[
            pl.BlockSpec((tm, d_model), lambda i: (i, 0)),
            pl.BlockSpec((d_model, 3 * d_model), lambda i: (0, 0)),  # resident
            pl.BlockSpec((1, 3 * d_model), lambda i: (0, 0)),        # resident
        ],
        out_specs=(out_spec, out_spec, out_spec),
        compiler_params=pltpu.CompilerParams(
            dimension_semantics=("parallel",),
            vmem_limit_bytes=_VMEM_LIMIT),
    )(x2d, w_qkv_t, b_qkv.reshape(1, 3 * d_model))


# ---------------------------------------------------------------------------
# Attention kernel with the W_o projection fused into the epilogue.
# Grid: (B, S_q tiles), both parallel (megacore).  Heads are an in-kernel
# static loop (grouped to >=128-lane width) so each head-group's context is
# folded straight into the resident W_o accumulation: context never hits HBM,
# all slicing is static, no cross-step accumulation needed.
# ---------------------------------------------------------------------------

def _head_group_size(num_heads, d_k):
    hg = max(1, min(num_heads, 128 // max(d_k, 1)))
    while num_heads % hg:
        hg -= 1
    return hg


def _choose_tq(S_q, S_k, num_heads, d_model):
    """Largest q-row tile whose per-step blocks fit the VMEM budget."""
    budget = (_VMEM_LIMIT * 85) // 100
    # tq-independent blocks (x2 = double buffering): K, V, W_o, b_o.
    fixed = 4 * (2 * (2 * S_k * d_model) + 2 * d_model * d_model + 2 * d_model)
    # Per-q-row bytes: attn block (H*S_k) + q + out (double-buffered) + acc.
    per_row = 4 * (2 * num_heads * S_k + 2 * d_model + 2 * d_model + d_model)
    avail = budget - fixed
    tq = avail // per_row if avail > 0 else 8
    tq = int(max(8, min(tq, 512)))
    if tq >= S_q:
        return S_q
    return (tq // 8) * 8


def _attention_wo_kernel(q_ref, k_ref, v_ref, wo_ref, bo_ref,
                         out_ref, attn_ref, acc_ref, *, num_heads, hg_sz):
    d_model = q_ref.shape[-1]
    d_k = d_model // num_heads
    mxu_dt = jnp.bfloat16 if MXU_BF16 else jnp.float32

    q = q_ref[0]        # (tq, d_model); 1/sqrt(d_k) already folded into W_q/b_q
    k = k_ref[0]        # (S_k, d_model)
    v = v_ref[0]        # (S_k, d_model)

    acc_ref[...] = jnp.zeros_like(acc_ref)

    for g in range(num_heads // hg_sz):          # static unroll over head groups
        ctx_parts = []
        for j in range(hg_sz):
            h = g * hg_sz + j
            lo = h * d_k
            qh = q[:, lo:lo + d_k].astype(mxu_dt)
            kh = k[:, lo:lo + d_k].astype(mxu_dt)
            vh = v[:, lo:lo + d_k].astype(mxu_dt)

            # q . k^T without materializing a transposed K copy.
            s = lax.dot_general(qh, kh, (((1,), (1,)), ((), ())),
                                preferred_element_type=jnp.float32)
            # numerically stable softmax; EXACT reciprocal so returned probs
            # match F.softmax (rows sum to 1).
            s = s - jnp.max(s, axis=-1, keepdims=True)
            e = jnp.exp(s)
            p = e * pl.reciprocal(jnp.sum(e, axis=-1, keepdims=True), approx=False)

            attn_ref[0, h] = p.astype(attn_ref.dtype)     # lane-dense (tq, S_k)
            ctx_parts.append(jnp.dot(p.astype(mxu_dt), vh,
                                     preferred_element_type=jnp.float32))

        ctx_g = ctx_parts[0] if hg_sz == 1 else jnp.concatenate(ctx_parts, axis=-1)
        # Fused output projection: >=128-wide contraction when hg_sz*d_k == 128;
        # per-group accumulation bounds live ranges (no H-wide concatenate).
        wo_g = wo_ref[g * hg_sz * d_k:(g + 1) * hg_sz * d_k, :]
        acc_ref[...] += jnp.dot(ctx_g, wo_g, preferred_element_type=jnp.float32)

    out_ref[0] = (acc_ref[...] + bo_ref[...]).astype(out_ref.dtype)


def attention_with_output_proj(Q, K, V, w_o_t, b_o, num_heads):
    """softmax((Q K^T)) V @ W_o + b_o with Q pre-scaled by 1/sqrt(d_k).
    Returns out (B, S_q, d_model) and attn (B, H, S_q, S_k)."""
    B, S_q, d_model = Q.shape
    S_k = K.shape[1]
    d_k = d_model // num_heads
    hg_sz = _head_group_size(num_heads, d_k)
    tq = _choose_tq(S_q, S_k, num_heads, d_model)

    kernel = functools.partial(_attention_wo_kernel,
                               num_heads=num_heads, hg_sz=hg_sz)
    return pl.pallas_call(
        kernel,
        out_shape=(jax.ShapeDtypeStruct((B, S_q, d_model), Q.dtype),
                   jax.ShapeDtypeStruct((B, num_heads, S_q, S_k), jnp.float32)),
        grid=(B, pl.cdiv(S_q, tq)),
        in_specs=[
            pl.BlockSpec((1, tq, d_model), lambda b, i: (b, i, 0)),
            pl.BlockSpec((1, S_k, d_model), lambda b, i: (b, 0, 0)),  # resident/b
            pl.BlockSpec((1, S_k, d_model), lambda b, i: (b, 0, 0)),  # resident/b
            pl.BlockSpec((d_model, d_model), lambda b, i: (0, 0)),    # resident W_o^T
            pl.BlockSpec((1, d_model), lambda b, i: (0, 0)),          # resident b_o
        ],
        out_specs=(
            pl.BlockSpec((1, tq, d_model), lambda b, i: (b, i, 0)),
            pl.BlockSpec((1, num_heads, tq, S_k), lambda b, i: (b, 0, i, 0)),
        ),
        scratch_shapes=[pltpu.VMEM((tq, d_model), jnp.float32)],
        compiler_params=pltpu.CompilerParams(
            dimension_semantics=("parallel", "parallel"),
            vmem_limit_bytes=_VMEM_LIMIT),
    )(Q, K, V, w_o_t, b_o.reshape(1, d_model))


# ---------------------------------------------------------------------------
# MultiHeadAttention forward
# ---------------------------------------------------------------------------

def _prep_weights(params, num_heads):
    d_model = params["W_q_w"].shape[0]
    d_k = d_model // num_heads
    scale = 1.0 / math.sqrt(d_k)
    # nn.Linear weights are (out, in): pre-transpose to (in, out) so the MXU RHS
    # is lane-contiguous; fold 1/sqrt(d_k) into W_q / b_q once (layout plumbing).
    return (params["W_q_w"].T * scale, params["W_q_b"] * scale,
            params["W_k_w"].T, params["W_k_b"],
            params["W_v_w"].T, params["W_v_b"],
            params["W_o_w"].T, params["W_o_b"])


def multi_head_self_attention(params, x, num_heads):
    """Self-attention fast path (query = key = value = x)."""
    B, S, d_model = x.shape
    assert d_model % num_heads == 0
    wq_t, bq, wk_t, bk, wv_t, bv, wo_t, bo = _prep_weights(params, num_heads)

    x2d = x.reshape(B * S, d_model)
    # Single fused (d, 3d) projection when the resident weight fits the budget;
    # otherwise fall back to three per-tensor projections.
    if 2 * 4 * d_model * 3 * d_model <= (_VMEM_LIMIT * 6) // 10:
        w_qkv_t = jnp.concatenate([wq_t, wk_t, wv_t], axis=1)
        b_qkv = jnp.concatenate([bq, bk, bv])
        Q2, K2, V2 = qkv_projection_fused(x2d, w_qkv_t, b_qkv)
    else:
        Q2 = linear(x2d, wq_t, bq)
        K2 = linear(x2d, wk_t, bk)
        V2 = linear(x2d, wv_t, bv)

    Q = Q2.reshape(B, S, d_model)
    K = K2.reshape(B, S, d_model)
    V = V2.reshape(B, S, d_model)
    out, attn = attention_with_output_proj(Q, K, V, wo_t, bo, num_heads)
    # dropout layers -> identity (eval / inference mode)
    return out, attn


def multi_head_attention(params, query, key, value, num_heads):
    """General path: query/key/value may be different tensors (cross-attention)."""
    B, S_q, d_model = query.shape
    S_k = key.shape[1]
    assert d_model % num_heads == 0
    wq_t, bq, wk_t, bk, wv_t, bv, wo_t, bo = _prep_weights(params, num_heads)

    Q = linear(query.reshape(B * S_q, d_model), wq_t, bq).reshape(B, S_q, d_model)
    K = linear(key.reshape(B * S_k, d_model), wk_t, bk).reshape(B, S_k, d_model)
    V = linear(value.reshape(B * S_k, d_model), wv_t, bv).reshape(B, S_k, d_model)

    out, attn = attention_with_output_proj(Q, K, V, wo_t, bo, num_heads)
    return out, attn


def init_params(key, d_model):
    """Deterministic init matching nn.Linear shapes: weight (out,in), bias (out,)."""
    ks = jax.random.split(key, 8)
    bound = 1.0 / math.sqrt(d_model)

    def w(k):
        return jax.random.uniform(k, (d_model, d_model), jnp.float32, -bound, bound)

    def b(k):
        return jax.random.uniform(k, (d_model,), jnp.float32, -bound, bound)

    return {
        "W_q_w": w(ks[0]), "W_q_b": b(ks[1]),
        "W_k_w": w(ks[2]), "W_k_b": b(ks[3]),
        "W_v_w": w(ks[4]), "W_v_b": b(ks[5]),
        "W_o_w": w(ks[6]), "W_o_b": b(ks[7]),
    }


def _reference(p, q, k, v, num_heads):
    """Pure-JAX f32 reference mirroring the PyTorch module."""
    d_model = q.shape[-1]
    d_k = d_model // num_heads
    B, S_q, _ = q.shape
    S_k = k.shape[1]

    def lin(x, w, b):
        return x @ w.T + b

    Q = lin(q, p["W_q_w"], p["W_q_b"]).reshape(B, S_q, num_heads, d_k).transpose(0, 2, 1, 3)
    K = lin(k, p["W_k_w"], p["W_k_b"]).reshape(B, S_k, num_heads, d_k).transpose(0, 2, 1, 3)
    V = lin(v, p["W_v_w"], p["W_v_b"]).reshape(B, S_k, num_heads, d_k).transpose(0, 2, 1, 3)
    scores = jnp.einsum("bhqd,bhkd->bhqk", Q, K) / jnp.sqrt(jnp.float32(d_k))
    a = jax.nn.softmax(scores, axis=-1)
    ctx = jnp.einsum("bhqk,bhkd->bhqd", a, V).transpose(0, 2, 1, 3).reshape(B, S_q, d_model)
    return lin(ctx, p["W_o_w"], p["W_o_b"]), a


if __name__ == "__main__":
    B, S, d_model, num_heads = 2, 8, 32, 4

    root = jax.random.PRNGKey(0)
    kp, kx, kq, kk, kv = jax.random.split(root, 5)
    params = init_params(kp, d_model)

    # --- self-attention path (fused QKV + fused W_o epilogue) ---
    x = jax.random.normal(kx, (B, S, d_model), jnp.float32)
    self_fwd = jax.jit(functools.partial(multi_head_self_attention, num_heads=num_heads))
    out, attn = self_fwd(params, x)
    jax.block_until_ready((out, attn))

    ref_out, ref_attn = _reference(params, x, x, x, num_heads)
    assert out.shape == (B, S, d_model)
    assert attn.shape == (B, num_heads, S, S)
    # tolerance absorbs the bf16 MXU operands (f32 accumulation) in attention
    assert bool(jnp.allclose(out, ref_out, atol=2e-2, rtol=2e-2))
    assert bool(jnp.allclose(attn, ref_attn, atol=2e-2, rtol=2e-2))

    # --- general cross-attention path (distinct q/k/v, S_q != S_k) ---
    S_kv = 16
    q_in = jax.random.normal(kq, (B, S, d_model), jnp.float32)
    k_in = jax.random.normal(kk, (B, S_kv, d_model), jnp.float32)
    v_in = jax.random.normal(kv, (B, S_kv, d_model), jnp.float32)
    cross_fwd = jax.jit(functools.partial(multi_head_attention, num_heads=num_heads))
    out2, attn2 = cross_fwd(params, q_in, k_in, v_in)
    jax.block_until_ready((out2, attn2))

    ref_out2, ref_attn2 = _reference(params, q_in, k_in, v_in, num_heads)
    assert out2.shape == (B, S, d_model)
    assert attn2.shape == (B, num_heads, S, S_kv)
    assert bool(jnp.allclose(out2, ref_out2, atol=2e-2, rtol=2e-2))
    assert bool(jnp.allclose(attn2, ref_attn2, atol=2e-2, rtol=2e-2))

    print("KERNEL_OK")
</pallas_src>

<mosaic_0001>
module attributes {stable_mosaic.version = 11 : i64} {
  func.func @_qkv_fused_kernel(%arg0: i32, %arg1: memref<16x32xf32, #tpu.memory_space<vmem>>, %arg2: memref<32x96xf32, #tpu.memory_space<vmem>>, %arg3: memref<1x96xf32, #tpu.memory_space<vmem>>, %arg4: memref<16x32xf32, #tpu.memory_space<vmem>>, %arg5: memref<16x32xf32, #tpu.memory_space<vmem>>, %arg6: memref<16x32xf32, #tpu.memory_space<vmem>>) attributes {dimension_semantics = [#tpu.dimension_semantics<parallel>], iteration_bounds = array<i64: 1>, scalar_prefetch = 0 : i64, scratch_operands = 0 : i64, tpu.core_type = #tpu.core_type<tc>, window_params = [{transform_indices = @transform_0, window_bounds = array<i64: 16, 32>}, {pipeline_mode = #tpu.pipeline_mode<synchronous>, transform_indices = @transform_1, window_bounds = array<i64: 32, 96>}, {pipeline_mode = #tpu.pipeline_mode<synchronous>, transform_indices = @transform_2, window_bounds = array<i64: 1, 96>}, {transform_indices = @transform_3, window_bounds = array<i64: 16, 32>}, {transform_indices = @transform_4, window_bounds = array<i64: 16, 32>}, {transform_indices = @transform_5, window_bounds = array<i64: 16, 32>}]} {
    %c0 = arith.constant 0 : index
    %c0_0 = arith.constant 0 : index
    %0 = vector.load %arg1[%c0, %c0_0] : memref<16x32xf32, #tpu.memory_space<vmem>>, vector<16x32xf32>
    %c0_1 = arith.constant 0 : index
    %c0_2 = arith.constant 0 : index
    %1 = vector.load %arg2[%c0_1, %c0_2] : memref<32x96xf32, #tpu.memory_space<vmem>>, vector<32x96xf32>
    %cst = arith.constant dense<0.000000e+00> : vector<16x96xf32>
    %2 = tpu.matmul %0, %1, %cst {dimension_numbers = #tpu.dot_dimension_numbers<[1], [0], [0], [1], [0, 0, 1, 1], [], []>} : vector<16x32xf32>, vector<32x96xf32>, vector<16x96xf32> -> vector<16x96xf32>
    %c0_3 = arith.constant 0 : index
    %c0_4 = arith.constant 0 : index
    %3 = vector.load %arg3[%c0_3, %c0_4] : memref<1x96xf32, #tpu.memory_space<vmem>>, vector<1x96xf32>
    %4 = vector.broadcast %3 : vector<1x96xf32> to vector<16x96xf32>
    %5 = arith.addf %2, %4 : vector<16x96xf32>
    %6 = vector.extract_strided_slice %5 {offsets = [0, 0], sizes = [16, 32], strides = [1, 1]} : vector<16x96xf32> to vector<16x32xf32>
    %c0_5 = arith.constant 0 : index
    %c0_6 = arith.constant 0 : index
    %7 = vector.load %arg4[%c0_5, %c0_6] : memref<16x32xf32, #tpu.memory_space<vmem>>, vector<16x32xf32>
    tpu.vector_store %arg4[%c0_5, %c0_6], %6 {strides = array<i32>} : memref<16x32xf32, #tpu.memory_space<vmem>>, vector<16x32xf32>,
    %8 = vector.extract_strided_slice %5 {offsets = [0, 32], sizes = [16, 32], strides = [1, 1]} : vector<16x96xf32> to vector<16x32xf32>
    %c0_7 = arith.constant 0 : index
    %c0_8 = arith.constant 0 : index
    %9 = vector.load %arg5[%c0_7, %c0_8] : memref<16x32xf32, #tpu.memory_space<vmem>>, vector<16x32xf32>
    tpu.vector_store %arg5[%c0_7, %c0_8], %8 {strides = array<i32>} : memref<16x32xf32, #tpu.memory_space<vmem>>, vector<16x32xf32>,
    %10 = vector.extract_strided_slice %5 {offsets = [0, 64], sizes = [16, 32], strides = [1, 1]} : vector<16x96xf32> to vector<16x32xf32>
    %c0_9 = arith.constant 0 : index
    %c0_10 = arith.constant 0 : index
    %11 = vector.load %arg6[%c0_9, %c0_10] : memref<16x32xf32, #tpu.memory_space<vmem>>, vector<16x32xf32>
    tpu.vector_store %arg6[%c0_9, %c0_10], %10 {strides = array<i32>} : memref<16x32xf32, #tpu.memory_space<vmem>>, vector<16x32xf32>,
    return
  }
  func.func @transform_0(%arg0: i32) -> (i32, i32) {
    %c0_i32 = arith.constant 0 : i32
    %c0_i32_0 = arith.constant 0 : i32
    return %arg0, %c0_i32 : i32, i32
  }
  func.func @transform_1(%arg0: i32) -> (i32, i32) {
    %c0_i32 = arith.constant 0 : i32
    %c0_i32_0 = arith.constant 0 : i32
    %c0_i32_1 = arith.constant 0 : i32
    return %c0_i32, %c0_i32_0 : i32, i32
  }
  func.func @transform_2(%arg0: i32) -> (i32, i32) {
    %c0_i32 = arith.constant 0 : i32
    %c0_i32_0 = arith.constant 0 : i32
    %c0_i32_1 = arith.constant 0 : i32
    return %c0_i32, %c0_i32_0 : i32, i32
  }
  func.func @transform_3(%arg0: i32) -> (i32, i32) {
    %c0_i32 = arith.constant 0 : i32
    %c0_i32_0 = arith.constant 0 : i32
    return %arg0, %c0_i32 : i32, i32
  }
  func.func @transform_4(%arg0: i32) -> (i32, i32) {
    %c0_i32 = arith.constant 0 : i32
    %c0_i32_0 = arith.constant 0 : i32
    return %arg0, %c0_i32 : i32, i32
  }
  func.func @transform_5(%arg0: i32) -> (i32, i32) {
    %c0_i32 = arith.constant 0 : i32
    %c0_i32_0 = arith.constant 0 : i32
    return %arg0, %c0_i32 : i32, i32
  }
}

module attributes {stable_mosaic.version = 11 : i64} {
  func.func @_attention_wo_kernel(%arg0: i32, %arg1: i32, %arg2: memref<1x8x32xf32, #tpu.memory_space<vmem>>, %arg3: memref<1x8x32xf32, #tpu.memory_space<vmem>>, %arg4: memref<1x8x32xf32, #tpu.memory_space<vmem>>, %arg5: memref<32x32xf32, #tpu.memory_space<vmem>>, %arg6: memref<1x32xf32, #tpu.memory_space<vmem>>, %arg7: memref<1x8x32xf32, #tpu.memory_space<vmem>>, %arg8: memref<1x4x8x8xf32, #tpu.memory_space<vmem>>, %arg9: memref<8x32xf32, #tpu.memory_space<vmem>>) attributes {dimension_semantics = [#tpu.dimension_semantics<parallel>, #tpu.dimension_semantics<parallel>], iteration_bounds = array<i64: 2, 1>, scalar_prefetch = 0 : i64, scratch_operands = 1 : i64, tpu.core_type = #tpu.core_type<tc>, window_params = [{transform_indices = @transform_0, window_bounds = array<i64: 1, 8, 32>}, {transform_indices = @transform_1, window_bounds = array<i64: 1, 8, 32>}, {transform_indices = @transform_2, window_bounds = array<i64: 1, 8, 32>}, {pipeline_mode = #tpu.pipeline_mode<synchronous>, transform_indices = @transform_3, window_bounds = array<i64: 32, 32>}, {pipeline_mode = #tpu.pipeline_mode<synchronous>, transform_indices = @transform_4, window_bounds = array<i64: 1, 32>}, {transform_indices = @transform_5, window_bounds = array<i64: 1, 8, 32>}, {transform_indices = @transform_6, window_bounds = array<i64: 1, 4, 8, 8>}]} {
    %c0 = arith.constant 0 : index
    %c0_0 = arith.constant 0 : index
    %c0_1 = arith.constant 0 : index
    %0 = vector.load %arg2[%c0, %c0_0, %c0_1] : memref<1x8x32xf32, #tpu.memory_space<vmem>>, vector<1x8x32xf32>
    %1 = vector.shape_cast %0 : vector<1x8x32xf32> to vector<8x32xf32>
    %c0_2 = arith.constant 0 : index
    %c0_3 = arith.constant 0 : index
    %c0_4 = arith.constant 0 : index
    %2 = vector.load %arg3[%c0_2, %c0_3, %c0_4] : memref<1x8x32xf32, #tpu.memory_space<vmem>>, vector<1x8x32xf32>
    %3 = vector.shape_cast %2 : vector<1x8x32xf32> to vector<8x32xf32>
    %c0_5 = arith.constant 0 : index
    %c0_6 = arith.constant 0 : index
    %c0_7 = arith.constant 0 : index
    %4 = vector.load %arg4[%c0_5, %c0_6, %c0_7] : memref<1x8x32xf32, #tpu.memory_space<vmem>>, vector<1x8x32xf32>
    %5 = vector.shape_cast %4 : vector<1x8x32xf32> to vector<8x32xf32>
    %cst = arith.constant 0.000000e+00 : f32
    %6 = vector.broadcast %cst : f32 to vector<8x32xf32>
    %c0_8 = arith.constant 0 : index
    %c0_9 = arith.constant 0 : index
    %7 = vector.load %arg9[%c0_8, %c0_9] : memref<8x32xf32, #tpu.memory_space<vmem>>, vector<8x32xf32>
    tpu.vector_store %arg9[%c0_8, %c0_9], %6 {strides = array<i32>} : memref<8x32xf32, #tpu.memory_space<vmem>>, vector<8x32xf32>,
    %8 = vector.extract_strided_slice %1 {offsets = [0, 0], sizes = [8, 8], strides = [1, 1]} : vector<8x32xf32> to vector<8x8xf32>
    %9 = arith.truncf %8 : vector<8x8xf32> to vector<8x8xbf16>
    %10 = vector.extract_strided_slice %3 {offsets = [0, 0], sizes = [8, 8], strides = [1, 1]} : vector<8x32xf32> to vector<8x8xf32>
    %11 = arith.truncf %10 : vector<8x8xf32> to vector<8x8xbf16>
    %12 = vector.extract_strided_slice %5 {offsets = [0, 0], sizes = [8, 8], strides = [1, 1]} : vector<8x32xf32> to vector<8x8xf32>
    %13 = arith.truncf %12 : vector<8x8xf32> to vector<8x8xbf16>
    %cst_10 = arith.constant dense<0.000000e+00> : vector<8x8xf32>
    %14 = tpu.matmul %9, %11, %cst_10 {dimension_numbers = #tpu.dot_dimension_numbers<[1], [1], [0], [0], [0, 0, 1, 0], [], []>} : vector<8x8xbf16>, vector<8x8xbf16>, vector<8x8xf32> -> vector<8x8xf32>
    %cst_11 = arith.constant dense<0xFF800000> : vector<8xf32>
    %15 = vector.multi_reduction <maximumf>, %14, %cst_11 [1] : vector<8x8xf32> to vector<8xf32>
    %16 = vector.shape_cast %15 : vector<8xf32> to vector<8x1xf32>
    %17 = vector.broadcast %16 : vector<8x1xf32> to vector<8x8xf32>
    %18 = arith.subf %14, %17 : vector<8x8xf32>
    %19 = math.exp %18 : vector<8x8xf32>
    %cst_12 = arith.constant dense<0.000000e+00> : vector<8xf32>
    %20 = vector.multi_reduction <add>, %19, %cst_12 [1] : vector<8x8xf32> to vector<8xf32>
    %21 = vector.shape_cast %20 : vector<8xf32> to vector<8x1xf32>
    %22 = tpu.reciprocal %21 : vector<8x1xf32> -> vector<8x1xf32>
    %23 = vector.broadcast %22 : vector<8x1xf32> to vector<8x8xf32>
    %24 = arith.mulf %19, %23 : vector<8x8xf32>
    %c0_13 = arith.constant 0 : index
    %c0_14 = arith.constant 0 : index
    %c0_15 = arith.constant 0 : index
    %c0_16 = arith.constant 0 : index
    %25 = vector.load %arg8[%c0_13, %c0_14, %c0_15, %c0_16] : memref<1x4x8x8xf32, #tpu.memory_space<vmem>>, vector<1x1x8x8xf32>
    %26 = vector.shape_cast %25 : vector<1x1x8x8xf32> to vector<8x8xf32>
    %27 = vector.shape_cast %24 : vector<8x8xf32> to vector<1x1x8x8xf32>
    tpu.vector_store %arg8[%c0_13, %c0_14, %c0_15, %c0_16], %27 {strides = array<i32>} : memref<1x4x8x8xf32, #tpu.memory_space<vmem>>, vector<1x1x8x8xf32>,
    %28 = arith.truncf %24 : vector<8x8xf32> to vector<8x8xbf16>
    %cst_17 = arith.constant dense<0.000000e+00> : vector<8x8xf32>
    %29 = tpu.matmul %28, %13, %cst_17 {dimension_numbers = #tpu.dot_dimension_numbers<[1], [0], [0], [1], [0, 0, 1, 1], [], []>} : vector<8x8xbf16>, vector<8x8xbf16>, vector<8x8xf32> -> vector<8x8xf32>
    %30 = vector.extract_strided_slice %1 {offsets = [0, 8], sizes = [8, 8], strides = [1, 1]} : vector<8x32xf32> to vector<8x8xf32>
    %31 = arith.truncf %30 : vector<8x8xf32> to vector<8x8xbf16>
    %32 = vector.extract_strided_slice %3 {offsets = [0, 8], sizes = [8, 8], strides = [1, 1]} : vector<8x32xf32> to vector<8x8xf32>
    %33 = arith.truncf %32 : vector<8x8xf32> to vector<8x8xbf16>
    %34 = vector.extract_strided_slice %5 {offsets = [0, 8], sizes = [8, 8], strides = [1, 1]} : vector<8x32xf32> to vector<8x8xf32>
    %35 = arith.truncf %34 : vector<8x8xf32> to vector<8x8xbf16>
    %cst_18 = arith.constant dense<0.000000e+00> : vector<8x8xf32>
    %36 = tpu.matmul %31, %33, %cst_18 {dimension_numbers = #tpu.dot_dimension_numbers<[1], [1], [0], [0], [0, 0, 1, 0], [], []>} : vector<8x8xbf16>, vector<8x8xbf16>, vector<8x8xf32> -> vector<8x8xf32>
    %cst_19 = arith.constant dense<0xFF800000> : vector<8xf32>
    %37 = vector.multi_reduction <maximumf>, %36, %cst_19 [1] : vector<8x8xf32> to vector<8xf32>
    %38 = vector.shape_cast %37 : vector<8xf32> to vector<8x1xf32>
    %39 = vector.broadcast %38 : vector<8x1xf32> to vector<8x8xf32>
    %40 = arith.subf %36, %39 : vector<8x8xf32>
    %41 = math.exp %40 : vector<8x8xf32>
    %cst_20 = arith.constant dense<0.000000e+00> : vector<8xf32>
    %42 = vector.multi_reduction <add>, %41, %cst_20 [1] : vector<8x8xf32> to vector<8xf32>
    %43 = vector.shape_cast %42 : vector<8xf32> to vector<8x1xf32>
    %44 = tpu.reciprocal %43 : vector<8x1xf32> -> vector<8x1xf32>
    %45 = vector.broadcast %44 : vector<8x1xf32> to vector<8x8xf32>
    %46 = arith.mulf %41, %45 : vector<8x8xf32>
    %c0_21 = arith.constant 0 : index
    %c1 = arith.constant 1 : index
    %c0_22 = arith.constant 0 : index
    %c0_23 = arith.constant 0 : index
    %47 = vector.load %arg8[%c0_21, %c1, %c0_22, %c0_23] : memref<1x4x8x8xf32, #tpu.memory_space<vmem>>, vector<1x1x8x8xf32>
    %48 = vector.shape_cast %47 : vector<1x1x8x8xf32> to vector<8x8xf32>
    %49 = vector.shape_cast %46 : vector<8x8xf32> to vector<1x1x8x8xf32>
    tpu.vector_store %arg8[%c0_21, %c1, %c0_22, %c0_23], %49 {strides = array<i32>} : memref<1x4x8x8xf32, #tpu.memory_space<vmem>>, vector<1x1x8x8xf32>,
    %50 = arith.truncf %46 : vector<8x8xf32> to vector<8x8xbf16>
    %cst_24 = arith.constant dense<0.000000e+00> : vector<8x8xf32>
    %51 = tpu.matmul %50, %35, %cst_24 {dimension_numbers = #tpu.dot_dimension_numbers<[1], [0], [0], [1], [0, 0, 1, 1], [], []>} : vector<8x8xbf16>, vector<8x8xbf16>, vector<8x8xf32> -> vector<8x8xf32>
    %52 = vector.extract_strided_slice %1 {offsets = [0, 16], sizes = [8, 8], strides = [1, 1]} : vector<8x32xf32> to vector<8x8xf32>
    %53 = arith.truncf %52 : vector<8x8xf32> to vector<8x8xbf16>
    %54 = vector.extract_strided_slice %3 {offsets = [0, 16], sizes = [8, 8], strides = [1, 1]} : vector<8x32xf32> to vector<8x8xf32>
    %55 = arith.truncf %54 : vector<8x8xf32> to vector<8x8xbf16>
    %56 = vector.extract_strided_slice %5 {offsets = [0, 16], sizes = [8, 8], strides = [1, 1]} : vector<8x32xf32> to vector<8x8xf32>
    %57 = arith.truncf %56 : vector<8x8xf32> to vector<8x8xbf16>
    %cst_25 = arith.constant dense<0.000000e+00> : vector<8x8xf32>
    %58 = tpu.matmul %53, %55, %cst_25 {dimension_numbers = #tpu.dot_dimension_numbers<[1], [1], [0], [0], [0, 0, 1, 0], [], []>} : vector<8x8xbf16>, vector<8x8xbf16>, vector<8x8xf32> -> vector<8x8xf32>
    %cst_26 = arith.constant dense<0xFF800000> : vector<8xf32>
    %59 = vector.multi_reduction <maximumf>, %58, %cst_26 [1] : vector<8x8xf32> to vector<8xf32>
    %60 = vector.shape_cast %59 : vector<8xf32> to vector<8x1xf32>
    %61 = vector.broadcast %60 : vector<8x1xf32> to vector<8x8xf32>
    %62 = arith.subf %58, %61 : vector<8x8xf32>
    %63 = math.exp %62 : vector<8x8xf32>
    %cst_27 = arith.constant dense<0.000000e+00> : vector<8xf32>
    %64 = vector.multi_reduction <add>, %63, %cst_27 [1] : vector<8x8xf32> to vector<8xf32>
    %65 = vector.shape_cast %64 : vector<8xf32> to vector<8x1xf32>
    %66 = tpu.reciprocal %65 : vector<8x1xf32> -> vector<8x1xf32>
    %67 = vector.broadcast %66 : vector<8x1xf32> to vector<8x8xf32>
    %68 = arith.mulf %63, %67 : vector<8x8xf32>
    %c0_28 = arith.constant 0 : index
    %c2 = arith.constant 2 : index
    %c0_29 = arith.constant 0 : index
    %c0_30 = arith.constant 0 : index
    %69 = vector.load %arg8[%c0_28, %c2, %c0_29, %c0_30] : memref<1x4x8x8xf32, #tpu.memory_space<vmem>>, vector<1x1x8x8xf32>
    %70 = vector.shape_cast %69 : vector<1x1x8x8xf32> to vector<8x8xf32>
    %71 = vector.shape_cast %68 : vector<8x8xf32> to vector<1x1x8x8xf32>
    tpu.vector_store %arg8[%c0_28, %c2, %c0_29, %c0_30], %71 {strides = array<i32>} : memref<1x4x8x8xf32, #tpu.memory_space<vmem>>, vector<1x1x8x8xf32>,
    %72 = arith.truncf %68 : vector<8x8xf32> to vector<8x8xbf16>
    %cst_31 = arith.constant dense<0.000000e+00> : vector<8x8xf32>
    %73 = tpu.matmul %72, %57, %cst_31 {dimension_numbers = #tpu.dot_dimension_numbers<[1], [0], [0], [1], [0, 0, 1, 1], [], []>} : vector<8x8xbf16>, vector<8x8xbf16>, vector<8x8xf32> -> vector<8x8xf32>
    %74 = vector.extract_strided_slice %1 {offsets = [0, 24], sizes = [8, 8], strides = [1, 1]} : vector<8x32xf32> to vector<8x8xf32>
    %75 = arith.truncf %74 : vector<8x8xf32> to vector<8x8xbf16>
    %76 = vector.extract_strided_slice %3 {offsets = [0, 24], sizes = [8, 8], strides = [1, 1]} : vector<8x32xf32> to vector<8x8xf32>
    %77 = arith.truncf %76 : vector<8x8xf32> to vector<8x8xbf16>
    %78 = vector.extract_strided_slice %5 {offsets = [0, 24], sizes = [8, 8], strides = [1, 1]} : vector<8x32xf32> to vector<8x8xf32>
    %79 = arith.truncf %78 : vector<8x8xf32> to vector<8x8xbf16>
    %cst_32 = arith.constant dense<0.000000e+00> : vector<8x8xf32>
    %80 = tpu.matmul %75, %77, %cst_32 {dimension_numbers = #tpu.dot_dimension_numbers<[1], [1], [0], [0], [0, 0, 1, 0], [], []>} : vector<8x8xbf16>, vector<8x8xbf16>, vector<8x8xf32> -> vector<8x8xf32>
    %cst_33 = arith.constant dense<0xFF800000> : vector<8xf32>
    %81 = vector.multi_reduction <maximumf>, %80, %cst_33 [1] : vector<8x8xf32> to vector<8xf32>
    %82 = vector.shape_cast %81 : vector<8xf32> to vector<8x1xf32>
    %83 = vector.broadcast %82 : vector<8x1xf32> to vector<8x8xf32>
    %84 = arith.subf %80, %83 : vector<8x8xf32>
    %85 = math.exp %84 : vector<8x8xf32>
    %cst_34 = arith.constant dense<0.000000e+00> : vector<8xf32>
    %86 = vector.multi_reduction <add>, %85, %cst_34 [1] : vector<8x8xf32> to vector<8xf32>
    %87 = vector.shape_cast %86 : vector<8xf32> to vector<8x1xf32>
    %88 = tpu.reciprocal %87 : vector<8x1xf32> -> vector<8x1xf32>
    %89 = vector.broadcast %88 : vector<8x1xf32> to vector<8x8xf32>
    %90 = arith.mulf %85, %89 : vector<8x8xf32>
    %c0_35 = arith.constant 0 : index
    %c3 = arith.constant 3 : index
    %c0_36 = arith.constant 0 : index
    %c0_37 = arith.constant 0 : index
    %91 = vector.load %arg8[%c0_35, %c3, %c0_36, %c0_37] : memref<1x4x8x8xf32, #tpu.memory_space<vmem>>, vector<1x1x8x8xf32>
    %92 = vector.shape_cast %91 : vector<1x1x8x8xf32> to vector<8x8xf32>
    %93 = vector.shape_cast %90 : vector<8x8xf32> to vector<1x1x8x8xf32>
    tpu.vector_store %arg8[%c0_35, %c3, %c0_36, %c0_37], %93 {strides = array<i32>} : memref<1x4x8x8xf32, #tpu.memory_space<vmem>>, vector<1x1x8x8xf32>,
    %94 = arith.truncf %90 : vector<8x8xf32> to vector<8x8xbf16>
    %cst_38 = arith.constant dense<0.000000e+00> : vector<8x8xf32>
    %95 = tpu.matmul %94, %79, %cst_38 {dimension_numbers = #tpu.dot_dimension_numbers<[1], [0], [0], [1], [0, 0, 1, 1], [], []>} : vector<8x8xbf16>, vector<8x8xbf16>, vector<8x8xf32> -> vector<8x8xf32>
    %96 = tpu.concatenate %29, %51, %73, %95 in 1 : vector<8x8xf32>, vector<8x8xf32>, vector<8x8xf32>, vector<8x8xf32> -> vector<8x32xf32>
    %c0_39 = arith.constant 0 : index
    %c0_40 = arith.constant 0 : index
    %97 = vector.load %arg5[%c0_39, %c0_40] : memref<32x32xf32, #tpu.memory_space<vmem>>, vector<32x32xf32>
    %c0_41 = arith.constant 0 : index
    %c0_42 = arith.constant 0 : index
    %98 = vector.load %arg9[%c0_41, %c0_42] : memref<8x32xf32, #tpu.memory_space<vmem>>, vector<8x32xf32>
    %cst_43 = arith.constant dense<0.000000e+00> : vector<8x32xf32>
    %99 = tpu.matmul %96, %97, %cst_43 {dimension_numbers = #tpu.dot_dimension_numbers<[1], [0], [0], [1], [0, 0, 1, 1], [], []>} : vector<8x32xf32>, vector<32x32xf32>, vector<8x32xf32> -> vector<8x32xf32>
    %100 = arith.addf %98, %99 : vector<8x32xf32>
    %c0_44 = arith.constant 0 : index
    %c0_45 = arith.constant 0 : index
    %101 = vector.load %arg9[%c0_44, %c0_45] : memref<8x32xf32, #tpu.memory_space<vmem>>, vector<8x32xf32>
    tpu.vector_store %arg9[%c0_44, %c0_45], %100 {strides = array<i32>} : memref<8x32xf32, #tpu.memory_space<vmem>>, vector<8x32xf32>,
    %c0_46 = arith.constant 0 : index
    %c0_47 = arith.constant 0 : index
    %102 = vector.load %arg9[%c0_46, %c0_47] : memref<8x32xf32, #tpu.memory_space<vmem>>, vector<8x32xf32>
    %c0_48 = arith.constant 0 : index
    %c0_49 = arith.constant 0 : index
    %103 = vector.load %arg6[%c0_48, %c0_49] : memref<1x32xf32, #tpu.memory_space<vmem>>, vector<1x32xf32>
    %104 = vector.broadcast %103 : vector<1x32xf32> to vector<8x32xf32>
    %105 = arith.addf %102, %104 : vector<8x32xf32>
    %c0_50 = arith.constant 0 : index
    %c0_51 = arith.constant 0 : index
    %c0_52 = arith.constant 0 : index
    %106 = vector.load %arg7[%c0_50, %c0_51, %c0_52] : memref<1x8x32xf32, #tpu.memory_space<vmem>>, vector<1x8x32xf32>
    %107 = vector.shape_cast %106 : vector<1x8x32xf32> to vector<8x32xf32>
    %108 = vector.shape_cast %105 : vector<8x32xf32> to vector<1x8x32xf32>
    tpu.vector_store %arg7[%c0_50, %c0_51, %c0_52], %108 {strides = array<i32>} : memref<1x8x32xf32, #tpu.memory_space<vmem>>, vector<1x8x32xf32>,
    return
  }
  func.func @transform_0(%arg0: i32, %arg1: i32) -> (i32, i32, i32) {
    %c0_i32 = arith.constant 0 : i32
    %c0_i32_0 = arith.constant 0 : i32
    return %arg0, %arg1, %c0_i32 : i32, i32, i32
  }
  func.func @transform_1(%arg0: i32, %arg1: i32) -> (i32, i32, i32) {
    %c0_i32 = arith.constant 0 : i32
    %c0_i32_0 = arith.constant 0 : i32
    %c0_i32_1 = arith.constant 0 : i32
    return %arg0, %c0_i32, %c0_i32_0 : i32, i32, i32
  }
  func.func @transform_2(%arg0: i32, %arg1: i32) -> (i32, i32, i32) {
    %c0_i32 = arith.constant 0 : i32
    %c0_i32_0 = arith.constant 0 : i32
    %c0_i32_1 = arith.constant 0 : i32
    return %arg0, %c0_i32, %c0_i32_0 : i32, i32, i32
  }
  func.func @transform_3(%arg0: i32, %arg1: i32) -> (i32, i32) {
    %c0_i32 = arith.constant 0 : i32
    %c0_i32_0 = arith.constant 0 : i32
    %c0_i32_1 = arith.constant 0 : i32
    return %c0_i32, %c0_i32_0 : i32, i32
  }
  func.func @transform_4(%arg0: i32, %arg1: i32) -> (i32, i32) {
    %c0_i32 = arith.constant 0 : i32
    %c0_i32_0 = arith.constant 0 : i32
    %c0_i32_1 = arith.constant 0 : i32
    return %c0_i32, %c0_i32_0 : i32, i32
  }
  func.func @transform_5(%arg0: i32, %arg1: i32) -> (i32, i32, i32) {
    %c0_i32 = arith.constant 0 : i32
    %c0_i32_0 = arith.constant 0 : i32
    return %arg0, %arg1, %c0_i32 : i32, i32, i32
  }
  func.func @transform_6(%arg0: i32, %arg1: i32) -> (i32, i32, i32, i32) {
    %c0_i32 = arith.constant 0 : i32
    %c0_i32_0 = arith.constant 0 : i32
    %c0_i32_1 = arith.constant 0 : i32
    return %arg0, %c0_i32, %arg1, %c0_i32_0 : i32, i32, i32, i32
  }
}

</mosaic_0001>

<bundles_post_ra>
// kernel: multi_head_self_attention.2
= control target key start
LH: loop header
LB: loop body
LE: loop exit
PB: predicated region body
PF: predicated region fallthrough
CT: control target
= control target key end

     0   :  { %vm30_vm0 = vcmask 261120   ;;  %s175_s10 = smov 96   ;;  %s253_s1 = inlined_call_operand.vmem [shape: f32[32,96], index: 1, kind: input, shape index: {}]   ;;  %s254_s0 = inlined_call_operand.vmem [shape: f32[16,32], index: 0, kind: input, shape index: {}]   ;;  %s255_s2 = inlined_call_operand.vmem [shape: f32[1,96], index: 2, kind: input, shape index: {}]   ;;  %s256_s3 = inlined_call_operand.vmem [shape: f32[16,32], index: 3, kind: output, shape index: {0}]   ;;  %s257_s5 = inlined_call_operand.vmem [shape: f32[16,32], index: 5, kind: output, shape index: {2}]   ;;  %s258_s4 = inlined_call_operand.vmem [shape: f32[16,32], index: 4, kind: output, shape index: {1}]  }
   0x1   :  { %v19_v0 = vld [vmem:[%s253_s1] sm:$0xff]  ;;  %v20_v1 = vld [vmem:[%s253_s1 + $0x8] sm:$0xff]  ;;  %v21_v2 = vld [vmem:[%s253_s1 + $0x10] sm:$0xff] }
   0x2   :  { %v164_v3 = vpack.c.bf16 %v20_v1, %v19_v0  ;;  %v22_v4 = vld [vmem:[%s253_s1 + $0x18] sm:$0xff]  ;;  %v17_v5 = vld [vmem:[%s254_s0] sm:$0xff]  ;;  %v18_v7 = vld [vmem:[%s254_s0 + $0x8] sm:$0xff]  ;;  %s174_s0 = smov 64  }
   0x3   :  { %v168_v6 = vpack.c.bf16 %v22_v4, %v21_v2  ;;  %161 = vmatprep.mubr.msk.f32.mxu0 %vm30_vm0, %v17_v5  ;;  %v144_v8 = vld [vmem:[%s255_s2] ss:$0 sm:$0xff] }
   0x4   :  { %165 = vmatprep.subr.bf16.mxu0 %v164_v3 }
   0x5   :  { %167 = vmatpush3.bf16.msra.mxu0 %v164_v3 }
   0x6   :  { %169 = vmatprep.subr.bf16.mxu0 %v168_v6 }
   0x9   :  { %171 = vmatpush3.bf16.msra.mxu0 %v168_v6 }
   0xc   :  { %162 = vmatmul.mubr.msk.f32.vlgmr.msra.gmra.mrb[0].mxu0 %vm30_vm0, %v18_v7 }
  0xdf   :  { %v163_v9 = vpop.f32.mrb[0].mxu0 }
  0xe0   :  { %v109_v10 = vadd.f32 %v163_v9, %v144_v8  ;;  %v103_v11 = vpop.f32.mrb[1].mxu0 }
  0xe1   :  { %v104_v12 = vadd.f32 %v144_v8, %v103_v11 }
  0xe2   :  { %113 = vst.msk [vmem:[%s256_s3 + $0x8] sm:$0xff] %vm30_vm0, %v109_v10 }
  0xe3   :  { %112 = vst.msk [vmem:[%s256_s3] sm:$0xff] %vm30_vm0, %v104_v12  ;;  %124 = vrot.lane.b32.xlu1 %v104_v12, %s174_s0  ;;  %116 = vrot.lane.b32.xlu0 %v104_v12, %s175_s10 }
  0xe7   :  { %126 = vrot.lane.b32.xlu1 %v109_v10, %s174_s0  ;;  %118 = vrot.lane.b32.xlu0 %v109_v10, %s175_s10 }
 0x155   :  { %v125_v13 = vpop.permute.xlu1 %124  ;;  %v117_v14 = vpop.permute.xlu0 %116 }
 0x156   :  { %130 = vst.msk [vmem:[%s257_s5] sm:$0xff] %vm30_vm0, %v125_v13  ;;  %122 = vst.msk [vmem:[%s258_s4] sm:$0xff] %vm30_vm0, %v117_v14 }
 0x159   :  { %v127_v15 = vpop.permute.xlu1 %126  ;;  %v119_v16 = vpop.permute.xlu0 %118 }
 0x15a   :  { %131 = vst.msk [vmem:[%s257_s5 + $0x8] sm:$0xff] %vm30_vm0, %v127_v15  ;;  %123 = vst.msk [vmem:[%s258_s4 + $0x8] sm:$0xff] %vm30_vm0, %v119_v16 }

// kernel: multi_head_self_attention.3
= control target key start
LH: loop header
LB: loop body
LE: loop exit
PB: predicated region body
PF: predicated region fallthrough
CT: control target
= control target key end

     0   :  { %12 = vsyncpa [#allocation4], 0  ;;  %s1671_s0 = inlined_call_operand.vmem [shape: f32[2,8,32], index: 0, kind: input, shape index: {}]   ;;  %s1672_s1 = inlined_call_operand.vmem [shape: f32[2,8,32], index: 1, kind: input, shape index: {}]   ;;  %s1673_s2 = inlined_call_operand.vmem [shape: f32[2,8,32], index: 2, kind: input, shape index: {}]   ;;  %s1674_s3 = inlined_call_operand.vmem [shape: f32[32,32], index: 3, kind: input, shape index: {}]   ;;  %s1675_s4 = inlined_call_operand.vmem [shape: f32[1,32], index: 4, kind: input, shape index: {}]   ;;  %s1676_s5 = inlined_call_operand.hbm [shape: f32[2,8,32], index: 5, kind: output, shape index: {0}]   ;;  %s1677_s6 = inlined_call_operand.hbm [shape: f32[2,4,8,8], index: 6, kind: output, shape index: {1}]  }
   0x1   :  { %14 = vsyncpa [#allocation4 + $0x1], 0 }
   0x2   :  { %15 = vsyncpa [#allocation6], 0 }
   0x3   :  { %17 = vsyncpa [#allocation6 + $0x1], 0  ;;  %s1409_s21 = smov 0   ;;  %s1411_s22 = smov 0  }
   0x4   :  { %s1413_s23 = smov 0   ;;  %s1415_s24 = smov 0  }
   0x5   :  { %s1417_s25 = smov 0   ;;  %s1419_s26 = smov 0  }
   0x6 LB: > { %s1047_s27 = sadd.s32 4294967295, %s1360_s26   ;;  %s1048_s28 = sadd.s32 4294967294, %s1360_s26   ;;  %s1360_s26 = sphi %s1419_s26, %s23_s26   ;;  %s1356_s25 = sphi %s1417_s25, %s1684_s25   ;;  %s1352_s24 = sphi %s1415_s24, %s1683_s24   ;;  %s1348_s23 = sphi %s1413_s23, %s1682_s23   ;;  %s1344_s22 = sphi %s1411_s22, %s1681_s22   ;;  %s1340_s21 = sphi %s1409_s21, %s1680_s21  }
   0x7   : > { %s35_s29 = sadd.s32 1, %s1356_s25  ;;  %s166_s30 = sadd.s32 1, %s1348_s23 }
   0x8   : > { %p37_p0 = scmp.ge.s32.totalorder %s35_s29, 2  ;;  %p176_p1 = scmp.ne.s32.totalorder %s1348_s23, %s1344_s22 }
   0x9   : > { %p177_p2 = scmp.eq.s32.totalorder %s1047_s27, 1  ;;  %p182_p3 = scmp.ne.s32.totalorder %s1344_s22, %s1340_s21 }
   0xa   : > { %s1686_s29 = smov (%p37_p0, %s35_s29), 0  ;;  %p183_p5 = scmp.eq.s32.totalorder %s1048_s28, 1 }
   0xb   : > { %p1449_p4 = por %p177_p2, %p176_p1  ;;  %s161_s8 = ssub.s32 %s1356_s25, %s1686_s29 }
   0xc   : > { %p1051_p6 = scmp.ge.s32.totalorder %s1360_s26, 1  ;;  %p164_p7 = scmp.eq.s32.totalorder %s161_s8, 0 }
   0xd   : > { %p1456_p8 = por %p183_p5, %p182_p3  ;;  %p259_p9 = scmp.lt.s32.totalorder %s1360_s26, 3 }
   0xe   : > { %s1462_s10 = scalar_select %p164_p7, %s1348_s23, %s166_s30  }
   0xf   : > { %p260_p10 = pnand %p1051_p6, %p259_p9 }
  0x10   : > { %p304_p11 = scmp.lt.s32.totalorder (!%p260_p10), %s1352_s24, 1  ;;  %v1362_v0 = vmov (!%p260_p10), 0.0   ;;  %vm1363_vm0 = vmmov (!%p260_p10), 0   ;;  %vm328_vm1 = vcmask (!%p260_p10), 64512   ;;  %s1364_s19 = smov (!%p260_p10), 120   ;;  %vm391_vm2 = vcmask (!%p260_p10), 1043456  }
  0x11   : > { %263 = sbr.rel (%p260_p10) target bundleno = 1722 (0x6ba), region = 40  ;;  %1099 = vmatprep.subr.bf16.mxu0 (!%p260_p10), %v1362_v0  ;;  %1101 = vmatprep.mubr.msk.bf16.mxu0 (!%p260_p10), %vm1363_vm0, %v1362_v0  ;;  %s1365_s20 = smov (!%p260_p10), 112   ;;  %vm323_vm3 = vcmask (!%p260_p10), 261120   ;;  %vm787_vm4 = vcmask (!%p260_p10), 130048   ;;  %vm789_vm5 = vcmask (!%p260_p10), 195584  }
  0x12   : > { %1105 = vmatprep.subr.bf16.mxu1 (!%p260_p10), %v1362_v0  ;;  %1107 = vmatprep.mubr.msk.bf16.mxu1 (!%p260_p10), %vm1363_vm0, %v1362_v0  ;;  %s1366_s27 = smov (!%p260_p10), 104   ;;  %s1368_s28 = smov (!%p260_p10), 8   ;;  %324 = vst.msk [vmem:[#allocation2] sm:$0xff] (!%p260_p10), %vm323_vm3, %v1362_v0 }
  0x13   : > { %s1369_s30 = smov (!%p260_p10), 16   ;;  %s1077_s14 = sshll.u32 (!%p260_p10), %s1352_s24, 9 }
  0x14   : > { %s1586_s17 = scalar_lea.hbm (!%p260_p10), %s1677_s6, %s1077_s14 }
  0x18   : > { %s305_s11 = scalar_select %p304_p11, %s1352_s24, 1 }
  0x1a   : > { %s1472_s12 = sshll.u32 %s305_s11, 3  ;;  %s1505_s11 = sand.u32 1, %s1344_s22  }
  0x1b   : > { %s314_s15 = scalar_lea.vmem %s1672_s1, %s1472_s12  ;;  %s310_s18 = scalar_lea.vmem %s1671_s0, %s1472_s12 }
  0x1c   : > { %v321_v1 = vld [vmem:[%s314_s15] sm:$0xff]  ;;  %s318_s8 = scalar_lea.vmem %s1673_s2, %s1472_s12  ;;  %s1053_s13 = sshll.u32 %s1505_s11, 5 }
  0x1d   : > { %v326_v2 = vpack.c.bf16 %v321_v1, %v321_v1  ;;  %v320_v4 = vld [vmem:[%s310_s18] sm:$0xff]  ;;  %s1509_s12 = scalar_lea.vmem [#allocation5], %s1053_s13  ;;  %s887_s18 = scalar_lea.sflag [#allocation6], %s1505_s11 }
  0x1e   : > { %v325_v5 = vpack.c.bf16 %v320_v4, %v320_v4  ;;  %v322_v16 = vld [vmem:[%s318_s8] sm:$0xff]  ;;  %s1370_s8 = smov 24   ;;  %s915_s13 = sshll.u32 %s1509_s12, 4  ;;  %s1581_s13 = int_to_ptr.vmem [resolvable:$true] %s915_s13 }
  0x1f   : > { %v333_v3 = vsel %vm328_vm1, %v326_v2, 0  ;;  %439 = vrot.lane.b32.xlu1 %v326_v2, %s1364_s19  ;;  %v1498_v17 = vpack.c.bf16 %v322_v16, %v322_v16 }
  0x20   : > { %1100 = vmatpush3.bf16.xpose.msra.mxu0 %v333_v3 }
  0x21   : > { %1117 = vmatprep.subr.bf16.mxu0 %v1362_v0  ;;  %v393_v18 = vsel %vm391_vm2, %v1498_v17, 0 }
  0x22   : > { %1106 = vmatpush3.bf16.msra.mxu1 %v393_v18 }
  0x23   : > { %436 = vrot.lane.b32.xlu1 %v325_v5, %s1364_s19  ;;  %1111 = vmatprep.subr.bf16.mxu1 %v1362_v0 }
  0x27   : > { %1102 = vmatmul.mubr.msk.bf16.vlgmr.msra.gmra.mrb[0].mxu0 %vm328_vm1, %v325_v5  ;;  %550 = vrot.lane.b32.xlu1 %v325_v5, %s1365_s20 }
  0x28   : > { %1119 = vmatprep.mubr.msk.bf16.mxu0 %vm1363_vm0, %v1362_v0 }
  0x2b   : > { %664 = vrot.lane.b32.xlu1 %v326_v2, %s1366_s27 }
  0x2f   : > { %662 = vrot.lane.b32.xlu1 %v325_v5, %s1366_s27 }
  0x91   : > { %v440_v21 = vpop.permute.xlu1 %439 }
  0x92   : > { %v445_v23 = vsel %vm328_vm1, %v440_v21, 0  ;;  %v791_v21 = vld [vmem:[%s1674_s3] sm:$0xff] }
  0x95   : > { %v437_v25 = vpop.permute.xlu1 %436 }
  0x99   : > { %v551_v27 = vpop.permute.xlu1 %550 }
  0x9d   : > { %v665_v29 = vpop.permute.xlu1 %664 }
  0x9e   : > { %v670_v30 = vsel %vm328_vm1, %v665_v29, 0 }
  0xa1   : > { %v663_v31 = vpop.permute.xlu1 %662 }
  0xfa   : > { %v369_v6 = vpop.f32.mrb[0].mxu0 }
  0xfb   : > { %v1103_v7 = vpop.f32.mrb[1].mxu0  ;;  %v375_v8 = vsel %vm328_vm1, %v369_v6, -inf }
  0xfc   : > { %376 = vmax.xlane.f32.xlu0 %v375_v8  ;;  %v372_v9 = vpop.f32.mrb[2].mxu0 }
  0xfd   : > { %v1104_v10 = vpop.f32.mrb[3].mxu0 }
 0x189   : > { %v377_v11 = vpop.xlane.xlu0 %376 }
 0x18a   : > { %v378_v12 = vsub.f32 %v369_v6, %v377_v11 }
 0x18c   : > { %v379_v13 = vmul.f32 1.442695, %v378_v12 }
 0x18e   : > { %1234 = vpow2.f32 %v379_v13 }
 0x198   : > { %v1235_v14 = vpop.eup %1234 }
 0x199   : > { %v381_v15 = vsel %vm328_vm1, %v1235_v14, 0.0 }
 0x19a   : > { %382 = vadd.xlane.f32.xlu0 %v381_v15 }
 0x1b0   : > { %552 = vrot.lane.b32.xlu0 %v326_v2, %s1365_s20 }
 0x227   : > { %v383_v19 = vpop.xlane.xlu0 %382 }
 0x228   : > { %1236 = vrcp.f32 %v383_v19 }
 0x22b   : > { %v553_v26 = vpop.permute.xlu0 %552 }
 0x22c   : > { %v558_v28 = vsel %vm328_vm1, %v553_v26, 0  ;;  %v794_v26 = vld [vmem:[%s1674_s3 + $0x18] sm:$0xff] }
 0x232   : > { %v1237_v20 = vpop.eup %1236 }
 0x233   : > { %v385_v22 = vmul.f32 %v1237_v20, %v1235_v14 }
 0x235   : > { %v387_v24 = vpack.c.bf16 %v385_v22, %v385_v22  ;;  %386 = vst.msk [vmem:[%s1509_s12] sm:$0xff] %vm328_vm1, %v385_v22  ;;  %v792_v22 = vld [vmem:[%s1674_s3 + $0x8] sm:$0xff] }
 0x237   : > { %1108 = vmatmul.mubr.msk.bf16.vlgmr.msra.gmra.mrb[0].mxu1 %vm328_vm1, %v387_v24  ;;  %v1367_v24 = vmov 0.0|0.0  }
 0x238   : > { %1112 = vmatpush3.bf16.xpose.msra.mxu1 %v445_v23  ;;  %1113 = vmatprep.mubr.msk.bf16.mxu1 %vm1363_vm0, %v1362_v0  ;;  %v793_v23 = vld [vmem:[%s1674_s3 + $0x10] sm:$0xff] }
 0x239   : > { %1123 = vmatprep.subr.bf16.mxu1 %v1362_v0 }
 0x23f   : > { %1114 = vmatmul.mubr.msk.bf16.vlgmr.msra.gmra.mrb[4].mxu1 %vm328_vm1, %v437_v25  ;;  %v1159_v25 = vpack.c.bf16 %v792_v22, %v791_v21 }
 0x240   : > { %1124 = vmatpush3.bf16.xpose.msra.mxu1 %v558_v28  ;;  %1125 = vmatprep.mubr.msk.bf16.mxu1 %vm1363_vm0, %v1362_v0 }
 0x241   : > { %1135 = vmatprep.subr.bf16.mxu1 %v1362_v0 }
 0x247   : > { %1126 = vmatmul.mubr.msk.bf16.vlgmr.msra.gmra.mrb[8].mxu1 %vm328_vm1, %v551_v27  ;;  %v1162_v27 = vpack.c.bf16 %v794_v26, %v793_v23 }
 0x248   : > { %1136 = vmatpush3.bf16.xpose.msra.mxu1 %v670_v30  ;;  %1137 = vmatprep.mubr.msk.bf16.mxu1 %vm1363_vm0, %v1362_v0 }
 0x249   : > { %1158 = vmatprep.subr.bf16.mxu1 %v1367_v24 }
 0x24f   : > { %1138 = vmatmul.mubr.msk.bf16.vlgmr.msra.gmra.mrb[12].mxu1 %vm328_vm1, %v663_v31 }
 0x250   : > { %1155 = vmatprep.mubr.msk.f32.mxu1 %vm1363_vm0, %v1362_v0  ;;  %1160 = vmatpush3.bf16.msra.mxu1 %v1159_v25 }
 0x251   : > { %1161 = vmatprep.subr.bf16.mxu1 %v1367_v24 }
 0x254   : > { %1163 = vmatpush3.bf16.msra.mxu1 %v1162_v27 }
 0x30a   : > { %v1529_v32 = vpop.f32.mrb[0].mxu1 }
 0x30b   : > { %v1109_v33 = vpop.f32.mrb[1].mxu1 }
 0x30c   : > { %v432_v34 = vpop.f32.mrb[2].mxu1 }
 0x30d   : > { %v1110_v35 = vpop.f32.mrb[3].mxu1 }
 0x312   : > { %v481_v36 = vpop.f32.mrb[4].mxu1 }
 0x313   : > { %v1115_v37 = vpop.f32.mrb[5].mxu1  ;;  %v487_v38 = vsel %vm328_vm1, %v481_v36, -inf }
 0x314   : > { %488 = vmax.xlane.f32.xlu1 %v487_v38  ;;  %v484_v39 = vpop.f32.mrb[6].mxu1 }
 0x315   : > { %v1116_v40 = vpop.f32.mrb[7].mxu1 }
 0x31a   : > { %v594_v41 = vpop.f32.mrb[8].mxu1 }
 0x31b   : > { %v600_v42 = vsel %vm328_vm1, %v594_v41, -inf  ;;  %v1127_v43 = vpop.f32.mrb[9].mxu1 }
 0x31c   : > { %601 = vmax.xlane.f32.xlu0 %v600_v42  ;;  %v597_v44 = vpop.f32.mrb[10].mxu1 }
 0x31d   : > { %v1128_v45 = vpop.f32.mrb[11].mxu1 }
 0x322   : > { %v706_v46 = vpop.f32.mrb[12].mxu1 }
 0x323   : > { %v712_v47 = vsel %vm328_vm1, %v706_v46, -inf  ;;  %v1139_v48 = vpop.f32.mrb[13].mxu1 }
 0x324   : > { %713 = vmax.xlane.f32.xlu1 %v712_v47  ;;  %v709_v49 = vpop.f32.mrb[14].mxu1 }
 0x325   : > { %v1140_v50 = vpop.f32.mrb[15].mxu1 }
 0x3a1   : > { %v489_v51 = vpop.xlane.xlu1 %488 }
 0x3a2   : > { %v490_v52 = vsub.f32 %v481_v36, %v489_v51 }
 0x3a4   : > { %v491_v53 = vmul.f32 1.442695, %v490_v52 }
 0x3a6   : > { %1238 = vpow2.f32 %v491_v53 }
 0x3a9   : > { %v602_v54 = vpop.xlane.xlu0 %601 }
 0x3aa   : > { %v603_v55 = vsub.f32 %v594_v41, %v602_v54 }
 0x3ac   : > { %v604_v56 = vmul.f32 1.442695, %v603_v55 }
 0x3ae   : > { %1240 = vpow2.f32 %v604_v56 }
 0x3b0   : > { %v1239_v57 = vpop.eup %1238 }
 0x3b1   : > { %v493_v58 = vsel %vm328_vm1, %v1239_v57, 0.0  ;;  %v714_v61 = vpop.xlane.xlu1 %713 }
 0x3b2   : > { %494 = vadd.xlane.f32.xlu1 %v493_v58  ;;  %v715_v62 = vsub.f32 %v706_v46, %v714_v61 }
 0x3b4   : > { %v716_v63 = vmul.f32 1.442695, %v715_v62 }
 0x3b6   : > { %1242 = vpow2.f32 %v716_v63 }
 0x3b8   : > { %v1241_v59 = vpop.eup %1240 }
 0x3b9   : > { %v606_v60 = vsel %vm328_vm1, %v1241_v59, 0.0 }
 0x3ba   : > { %607 = vadd.xlane.f32.xlu0 %v606_v60 }
 0x3c0   : > { %v1243_v1 = vpop.eup %1242 }
 0x3c1   : > { %v718_v2 = vsel %vm328_vm1, %v1243_v1, 0.0 }
 0x3c3   : > { %614 = vrot.lane.b32.xlu1 %v1498_v17, %s1365_s20  ;;  %s1371_s20 = smov [#allocation5]  }
 0x3d0   : > { %502 = vrot.lane.b32.xlu0 %v1498_v17, %s1364_s19  ;;  %s1250_s19 = scalar_lea.vmem %s1581_s13, 512 }
 0x3d1   : > { %p1251_p12 = scmp.ne.s32.totalorder %s1581_s13, %s1250_s19 }
 0x3d3   : > { %p1252_p13 = pnand %p1251_p12, %p1449_p4 }
 0x3d5   : > { %p1253_p0 = pneg %p1252_p13 }
 0x3e7   : > { %719 = vadd.xlane.f32.xlu1 %v718_v2 }
 0x3f8   : > { %726 = vrot.lane.b32.xlu1 %v1498_v17, %s1366_s27  ;;  %s1254_s27 = sshll.u32 %s1371_s20, 4  ;;  %s1255_s27 = int_to_ptr.vmem [resolvable:$false] %s1254_s27 }
 0x3f9   : > { %p1257_p1 = scmp.lt.s32.totalorder %s1581_s13, %s1255_s27 }
 0x43f   : > { %v495_v3 = vpop.xlane.xlu1 %494 }
 0x440   : > { %1244 = vrcp.f32 %v495_v3 }
 0x443   : > { %v615_v9 = vpop.permute.xlu1 %614 }
 0x444   : > { %v620_v11 = vsel %vm391_vm2, %v615_v9, 0 }
 0x447   : > { %v608_v4 = vpop.xlane.xlu0 %607 }
 0x448   : > { %1246 = vrcp.f32 %v608_v4 }
 0x44a   : > { %v1245_v5 = vpop.eup %1244 }
 0x44b   : > { %v497_v6 = vmul.f32 %v1245_v5, %v1239_v57  ;;  %v503_v7 = vpop.permute.xlu0 %502 }
 0x44c   : > { %v508_v8 = vsel %vm391_vm2, %v503_v7, 0 }
 0x44d   : > { %1118 = vmatpush3.bf16.msra.mxu0 %v508_v8  ;;  %v500_v10 = vpack.c.bf16 %v497_v6, %v497_v6  ;;  %1060 = vst.msk [vmem:[%s1509_s12 + $0x8] sm:$0xff] %vm328_vm1, %v497_v6 }
 0x44e   : > { %1129 = vmatprep.subr.bf16.mxu0 %v1362_v0 }
 0x450   : > { %1120 = vmatmul.mubr.msk.bf16.vlgmr.msra.gmra.mrb[4].mxu0 %vm328_vm1, %v500_v10 }
 0x451   : > { %1130 = vmatpush3.bf16.msra.mxu0 %v620_v11  ;;  %1131 = vmatprep.mubr.msk.bf16.mxu0 %vm1363_vm0, %v1362_v0 }
 0x452   : > { %v1247_v12 = vpop.eup %1246  ;;  %1141 = vmatprep.subr.bf16.mxu0 %v1362_v0 }
 0x453   : > { %v610_v13 = vmul.f32 %v1247_v12, %v1241_v59 }
 0x455   : > { %v613_v14 = vpack.c.bf16 %v610_v13, %v610_v13  ;;  %1063 = vst.msk [vmem:[%s1509_s12 + $0x10] sm:$0xff] %vm328_vm1, %v610_v13 }
 0x458   : > { %1132 = vmatmul.mubr.msk.bf16.vlgmr.msra.gmra.mrb[8].mxu0 %vm328_vm1, %v613_v14 }
 0x459   : > { %1143 = vmatprep.mubr.msk.bf16.mxu0 %vm1363_vm0, %v1362_v0 }
 0x474   : > { %v720_v15 = vpop.xlane.xlu1 %719 }
 0x475   : > { %1248 = vrcp.f32 %v720_v15 }
 0x478   : > { %v727_v16 = vpop.permute.xlu1 %726 }
 0x479   : > { %v732_v17 = vsel %vm391_vm2, %v727_v16, 0 }
 0x47a   : > { %1142 = vmatpush3.bf16.msra.mxu0 %v732_v17 }
 0x47f   : > { %v1249_v18 = vpop.eup %1248 }
 0x480   : > { %v722_v19 = vmul.f32 %v1249_v18, %v1243_v1 }
 0x482   : > { %v725_v20 = vpack.c.bf16 %v722_v19, %v722_v19  ;;  %1066 = vst.msk [vmem:[%s1509_s12 + $0x18] sm:$0xff] %vm328_vm1, %v722_v19  ;;  %s1256_s12 = scalar_lea.vmem %s1255_s27, 1024 }
 0x483   : > { %p1258_p2 = scmp.lt.s32.totalorder %s1256_s12, %s1250_s19 }
 0x484   : > { %1144 = vmatmul.mubr.msk.bf16.vlgmr.msra.gmra.mrb[12].mxu0 %vm328_vm1, %v725_v20 }
 0x485   : > { %p1259_p3 = por %p1258_p2, %p1257_p1 }
 0x487   : > { %p1260_p5 = pnand %p1259_p3, %p1253_p0 }
 0x523   : > { %v544_v28 = vpop.f32.mrb[4].mxu0 }
 0x524   : > { %775 = vrot.lane.b32.xlu0 %v544_v28, %s1368_s28  ;;  %v1121_v29 = vpop.f32.mrb[5].mxu0 }
 0x525   : > { %v547_v30 = vpop.f32.mrb[6].mxu0 }
 0x526   : > { %v1122_v31 = vpop.f32.mrb[7].mxu0 }
 0x52b   : > { %v656_v33 = vpop.f32.mrb[8].mxu0 }
 0x52c   : > { %779 = vrot.lane.b32.xlu1 %v656_v33, %s1369_s30  ;;  %v1133_v34 = vpop.f32.mrb[9].mxu0 }
 0x52d   : > { %v659_v35 = vpop.f32.mrb[10].mxu0 }
 0x52e   : > { %v1134_v36 = vpop.f32.mrb[11].mxu0 }
 0x557   : > { %v768_v37 = vpop.f32.mrb[12].mxu0 }
 0x558   : > { %783 = vrot.lane.b32.xlu0 %v768_v37, %s1370_s8  ;;  %v1145_v38 = vpop.f32.mrb[13].mxu0 }
 0x559   : > { %v771_v39 = vpop.f32.mrb[14].mxu0 }
 0x55a   : > { %v1146_v40 = vpop.f32.mrb[15].mxu0 }
 0x596   : > { %v776_v41 = vpop.permute.xlu0 %775 }
 0x597   : > { %v786_v43 = vsel %vm328_vm1, %v1529_v32, %v776_v41 }
 0x59e   : > { %v780_v42 = vpop.permute.xlu1 %779 }
 0x59f   : > { %v788_v44 = vsel %vm787_vm4, %v786_v43, %v780_v42 }
 0x5ca   : > { %v784_v45 = vpop.permute.xlu0 %783 }
 0x5cb   : > { %v790_v0 = vsel %vm789_vm5, %v788_v44, %v784_v45 }
 0x5cc   : > { %1156 = vmatmul.mubr.msk.f32.vlgmr.msra.gmra.mrb[16].mxu1 %vm323_vm3, %v790_v0 }
 0x5cd   : > { %1263 = shalt.err (!%p1260_p5)
}
 0x5ce   : > { %s1264_s30 = scalar_lea.hbm %s1586_s17, 512  ;;  %s1268_s15 = scalar_lea.hbm %s1677_s6, 1024 }
 0x5cf   : > { %p1265_p6 = scmp.ne.s32.totalorder %s1586_s17, %s1264_s30  ;;  %p1269_p10 = scmp.lt.u32.totalorder %s1586_s17, %s1677_s6 }
 0x5d0   : > { %p1270_p11 = scmp.lt.u32.totalorder %s1268_s15, %s1264_s30  ;;  %p1272_p13 = scmp.lt.u32.totalorder %s1264_s30, %s1586_s17 }
 0x5d1   : > { %p1266_p7 = pnand %p1265_p6, %p1449_p4 }
 0x5d2   : > { %p1271_p12 = por %p1270_p11, %p1269_p10 }
 0x5d3   : > { %p1267_p9 = pneg %p1266_p7 }
 0x5d4   : > { %p1273_p0 = por %p1272_p13, %p1271_p12 }
 0x5d6   : > { %p1274_p1 = pnand %p1273_p0, %p1267_p9 }
 0x5d8   : > { %1277 = shalt.err (!%p1274_p1)
}
 0x5d9   : > { %s1372_s19 = smov 128   ;;  %v795_v32 = vld [vmem:[#allocation2] sm:$0xff]  ;;  %s1052_s27 = sshll.u32 %s1505_s11, 3 }
 0x5da   : > { %1165 = dma.vmem_to_hbm [thread:$0]  (%p1449_p4), %s1581_s13, 512, %s1586_s17, %s887_s18, %s1372_s19, %s1372_s19, %s1368_s28  }
 0x5db   : > { %v1069_v49 = vld [vmem:[%s1675_s4] ss:$0 sm:$0xff]  ;;  %s1072_s8 = sshll.u32 %s1352_s24, 7  ;;  %s296_s14 = scalar_lea.vmem [#allocation3], %s1052_s27 }
 0x5dc   : > { %s901_s15 = sshll.u32 %s296_s14, 4  ;;  %s1622_s13 = scalar_lea.hbm %s1676_s5, %s1072_s8  ;;  %s1624_s15 = int_to_ptr.vmem [resolvable:$true] %s901_s15 }
 0x5dd   : > { %s882_s17 = scalar_lea.sflag [#allocation4], %s1505_s11  ;;  %s1278_s18 = scalar_lea.vmem %s1624_s15, 128 }
 0x5de   : > { %p1279_p2 = scmp.ne.s32.totalorder %s1624_s15, %s1278_s18  ;;  %s1373_s24 = smov [#allocation3]  }
 0x5df   : > { %s1282_s20 = sshll.u32 %s1373_s24, 4  ;;  %s1283_s20 = int_to_ptr.vmem [resolvable:$false] %s1282_s20 }
 0x5e0   : > { %p1280_p3 = pnand %p1279_p2, %p1449_p4  ;;  %s1284_s19 = scalar_lea.vmem %s1283_s20, 256 }
 0x5e1   : > { %p1285_p6 = scmp.lt.s32.totalorder %s1624_s15, %s1283_s20  ;;  %p1286_p7 = scmp.lt.s32.totalorder %s1284_s19, %s1278_s18 }
 0x5e2   : > { %p1281_p5 = pneg %p1280_p3 }
 0x5e3   : > { %p1287_p9 = por %p1286_p7, %p1285_p6 }
 0x5e5   : > { %p1288_p10 = pnand %p1287_p9, %p1281_p5 }
 0x69f   : > { %v865_v46 = vpop.f32.mrb[16].mxu1 }
 0x6a0   : > { %v869_v47 = vadd.f32 %v865_v46, %v795_v32  ;;  %v1157_v48 = vpop.f32.mrb[17].mxu1 }
 0x6a2   : > { %870 = vst.msk [vmem:[#allocation2] sm:$0xff] %vm323_vm3, %v869_v47 }
 0x6a9   : > { %v871_v50 = vld [vmem:[#allocation2] sm:$0xff] }
 0x6aa   : > { %v879_v51 = vadd.f32 %v1069_v49, %v871_v50 }
 0x6ac   : > { %880 = vst.msk [vmem:[%s296_s14] sm:$0xff] %vm323_vm3, %v879_v51 }
 0x6ad   : > { %1291 = shalt.err (!%p1288_p10)
}
 0x6ae   : > { %s1292_s11 = scalar_lea.hbm %s1622_s13, 128  ;;  %s1296_s30 = scalar_lea.hbm %s1676_s5, 256 }
 0x6af   : > { %p1293_p11 = scmp.ne.s32.totalorder %s1622_s13, %s1292_s11  ;;  %p1297_p0 = scmp.lt.u32.totalorder %s1622_s13, %s1676_s5 }
 0x6b0   : > { %p1298_p1 = scmp.lt.u32.totalorder %s1296_s30, %s1292_s11  ;;  %p1300_p3 = scmp.lt.u32.totalorder %s1292_s11, %s1622_s13 }
 0x6b1   : > { %p1294_p12 = pnand %p1293_p11, %p1449_p4 }
 0x6b2   : > { %p1299_p2 = por %p1298_p1, %p1297_p0 }
 0x6b3   : > { %p1295_p13 = pneg %p1294_p12 }
 0x6b4   : > { %p1301_p5 = por %p1300_p3, %p1299_p2 }
 0x6b6   : > { %p1302_p6 = pnand %p1301_p5, %p1295_p13 }
 0x6b8   : > { %1305 = shalt.err (!%p1302_p6)
}
 0x6b9   : > { %1164 = dma.vmem_to_hbm [thread:$0]  (%p1449_p4), %s1624_s15, 128, %s1622_s13, %s882_s17  }
 0x6ba PF: > { %p1175_p7 = scmp.ge.s32.totalorder %s1360_s26, 2  ;;  %s930_s16 = sand.u32 1, %s1340_s21  }
 0x6bb   : > { %s931_s28 = scalar_lea.sflag [#allocation4], %s930_s16 }
 0x6bc   : > { %p1169_p9 = pnand %p1175_p7, %p1456_p8 }
 0x6be   : > { %1331 = dma.done.wait (!%p1169_p9), %s931_s28, 128  }
 0x6bf   : > { %1333 = vsyncadd (!%p1169_p9), %s931_s28, 4294967168  ;;  %s940_s18 = scalar_lea.sflag [#allocation6], %s930_s16 }
 0x6c0   : > { %1335 = dma.done.wait (!%p1169_p9), %s940_s18, 512  }
 0x6c1   : > { %1337 = vsyncadd (!%p1169_p9), %s940_s18, 4294966784  ;;  %s23_s26 = sadd.s32 1, %s1360_s26   ;;  %s1680_s21 = smov %s1344_s22 }
 0x6c2   : > { %p20_p10 = scmp.ge.s32.totalorder %s23_s26, 4   ;;  %s1681_s22 = smov %s1348_s23 }
 0x6c3   : > { %s1682_s23 = smov %s1462_s10  ;;  %s1683_s24 = smov %s1356_s25 }
 0x6c4   : > { %s1684_s25 = smov %s1686_s29  ;;  %22 = sbr.rel (!%p20_p10) target bundleno = 6 (0x6), region = 101 }
 0x6cb   :  { %945 = vsyncpa [#allocation4], 1 }
 0x6cc   :  { %947 = vsyncpa [#allocation4 + $0x1], 1 }
 0x6cd   :  { %948 = vsyncpa [#allocation6], 1 }
 0x6ce   :  { %950 = vsyncpa [#allocation6 + $0x1], 1 }

</bundles_post_ra>
